<compile_context>
chip_gen: v7x
topology: tpu7x:2x2x1
jax: 0.10.0
libtpu: 0.0.40
codegen_flags: <defaults>
</compile_context>

<pallas_src>
import functools

import jax
import jax.numpy as jnp
import numpy as np
from jax.experimental import pallas as pl
from jax.experimental.pallas import tpu as pltpu

_NUM_CORE_SLOTS = 2          # v7x megacore split; harmless serial split on v5e/v6e
_LIVE_F32_TEMPS = 4          # conservative count of full-width f32 temporaries


def _round_up(x, m):
    return ((x + m - 1) // m) * m


def _focal_loss_kernel(logits_ref, targets_ref, out_ref, *,
                       gamma, n_total, tile_n, tiles_per_core):
    i = pl.program_id(1)

    @pl.when(i == 0)
    def _():
        out_ref[...] = jnp.zeros_like(out_ref)

    # Load tile; upcast to f32 in-kernel (input may stream as bf16).
    logits = logits_ref[...].astype(jnp.float32)          # (TILE_N, C)
    tgt = targets_ref[...]                                 # (TILE_N, 1) int32

    # Numerically stable log-sum-exp.
    m = jnp.max(logits, axis=-1, keepdims=True)            # (TILE_N, 1)
    z = logits - m                                          # (TILE_N, C)
    sumexp = jnp.sum(jnp.exp(z), axis=-1, keepdims=True)    # (TILE_N, 1)

    # Gather the target logit with a select (no dynamic lane gather on TPU,
    # no bool->f32 cast, no extra full-tile multiply).
    col = jax.lax.broadcasted_iota(jnp.int32, z.shape, dimension=1)
    z_target = jnp.sum(jnp.where(col == tgt, z, 0.0), axis=-1, keepdims=True)

    # Per-sample cross-entropy; clamp tiny negative rounding so pt <= 1.
    ce = jnp.maximum(jnp.log(sumexp) - z_target, 0.0)        # (TILE_N, 1)
    pt = jnp.exp(-ce)                                        # per-row EUP exp

    one_minus_pt = 1.0 - pt
    g_int = int(gamma)
    if float(gamma) == float(g_int) and 0 <= g_int <= 4:
        # Integer-power fast path: plain VPU multiplies, no log/exp, no NaN.
        w = jnp.ones_like(one_minus_pt)
        for _ in range(g_int):
            w = w * one_minus_pt
    else:
        w = jnp.maximum(one_minus_pt, 0.0) ** gamma
    focal = w * ce                                           # alpha & 1/N in wrapper

    # Mask rows beyond the true batch: covers the ragged last tile *and* the
    # duplicated (clamped) blocks a core may re-read when tile counts are odd.
    # NOTE: keep the where-select (it does not propagate NaN/Inf from padded
    # rows); do NOT "simplify" to focal * mask.
    t_logical = pl.program_id(0) * tiles_per_core + i        # unclamped tile id
    row = jax.lax.broadcasted_iota(jnp.int32, focal.shape, 0) + t_logical * tile_n
    focal = jnp.where(row < n_total, focal, 0.0)

    out_ref[...] += jnp.sum(focal)                            # broadcast into (8,128)


def _vmem_capacity_bytes():
    try:
        return int(pltpu.get_tpu_info().vmem_capacity_bytes)
    except Exception:
        return 64 << 20          # conservative default (v7x)


def _choose_tile_n(n, c, itemsize, vmem_cap):
    """Pick TILE_N from the lane-padded VMEM working set, per generation."""
    c_pad = _round_up(max(c, 1), 128)
    per_row = (2 * c_pad * itemsize          # double-buffered streamed input tile
               + 2 * 128 * 4                 # double-buffered padded targets tile
               + _LIVE_F32_TEMPS * c_pad * 4)  # live f32 temporaries in the body
    # Use ~35% of physical VMEM for this kernel's working set, hard-capped.
    budget = min(int(vmem_cap * 0.35), 40 << 20)
    t = max(16, (budget // per_row) // 16 * 16)   # 16-row multiple (bf16 packing)
    t = min(t, 16384)
    if n <= t:
        return n                                  # single full-extent block (always legal)
    return t


def focal_loss(inputs, targets, alpha=1.0, gamma=2.0, tile_n_override=None):
    """inputs: (N, C) logits (f32 or bf16), targets: (N,) int class indices.

    Returns the scalar focal loss (f32).  Streaming bf16 logits halves HBM
    traffic (the kernel upcasts in VMEM).  Out-of-range target indices are
    silently treated as "no matching class" (ce = logsumexp), unlike torch
    which raises.
    """
    N, C = inputs.shape
    logits = inputs                                    # keep caller dtype (bf16 OK)
    tgt2d = targets.reshape(N, 1).astype(jnp.int32)

    itemsize = jnp.dtype(logits.dtype).itemsize
    vmem_cap = _vmem_capacity_bytes()
    tile_n = tile_n_override or _choose_tile_n(N, C, itemsize, vmem_cap)

    num_tiles = pl.cdiv(N, tile_n)
    tiles_per_core = pl.cdiv(num_tiles, _NUM_CORE_SLOTS)
    last_tile = num_tiles - 1

    # VMEM actually allocated (lane-padded, double-buffered) + in-kernel temps.
    c_pad = _round_up(C, 128)
    vmem_need = (2 * tile_n * c_pad * itemsize          # input tiles
                 + 2 * tile_n * 128 * 4                 # padded targets tiles
                 + _LIVE_F32_TEMPS * tile_n * c_pad * 4  # f32 temporaries
                 + 2 * 8 * 128 * 4                      # accumulator block
                 + (2 << 20))                           # headroom
    vmem_limit = int(min(max(vmem_need, 16 << 20), (vmem_cap * 3) // 4))

    def tile_map(c, i):
        # Clamp so the DMA never reads past the last valid block; the kernel
        # masks duplicated / padded rows via the unclamped logical index.
        return (jnp.minimum(c * tiles_per_core + i, last_tile), 0)

    cost = pl.CostEstimate(
        flops=8 * N * C,
        transcendentals=N * C + 3 * N,                  # exp/elem + log/exp per row
        bytes_accessed=N * C * itemsize + N * 4 + 2 * 8 * 128 * 4,
    )

    out = pl.pallas_call(
        functools.partial(_focal_loss_kernel, gamma=float(gamma), n_total=N,
                          tile_n=tile_n, tiles_per_core=tiles_per_core),
        out_shape=jax.ShapeDtypeStruct((8 * _NUM_CORE_SLOTS, 128), jnp.float32),
        grid=(_NUM_CORE_SLOTS, tiles_per_core),
        in_specs=[
            pl.BlockSpec((tile_n, C), tile_map),        # logits tile
            pl.BlockSpec((tile_n, 1), tile_map),        # target column tile
        ],
        # One resident (8,128) accumulator block per core slot.
        out_specs=pl.BlockSpec((8, 128), lambda c, i: (c, 0)),
        compiler_params=pltpu.CompilerParams(
            dimension_semantics=("parallel", "arbitrary"),
            vmem_limit_bytes=vmem_limit,
        ),
        cost_estimate=cost,
    )(logits, tgt2d)

    # Finalize: sum per-core partials, fold alpha and 1/N here (tiny scalar op).
    total = out[0, 0] + out[8, 0]
    return total * (float(alpha) / N)


def _focal_loss_ref(inputs, targets, alpha=1.0, gamma=2.0):
    # Pure-JAX reference mirroring F.cross_entropy(reduction='none').
    logp = jax.nn.log_softmax(inputs.astype(jnp.float32), axis=-1)
    ce = -jnp.take_along_axis(logp, targets[:, None].astype(jnp.int32), axis=-1)[:, 0]
    pt = jnp.exp(-ce)
    return jnp.mean(alpha * (1.0 - pt) ** gamma * ce)


if __name__ == "__main__":
    key = jax.random.PRNGKey(0)
    k1, k2, k3, k4 = jax.random.split(key, 4)

    # Small shapes consistent with the module: batch of 8 samples, 16 classes.
    N, C = 8, 16
    logits = jax.random.normal(k1, (N, C), dtype=jnp.float32)
    targets = jax.random.randint(k2, (N,), 0, C, dtype=jnp.int32)

    # f32 path (matches the torch module's default dtype).
    loss = focal_loss(logits, targets, alpha=1.0, gamma=2.0)
    jax.block_until_ready(loss)
    ref = _focal_loss_ref(logits, targets, alpha=1.0, gamma=2.0)
    np.testing.assert_allclose(np.asarray(loss), np.asarray(ref), rtol=1e-5, atol=1e-6)

    # bf16 streaming path (half the HBM bytes).
    logits_bf16 = logits.astype(jnp.bfloat16)
    loss_bf16 = focal_loss(logits_bf16, targets, alpha=1.0, gamma=2.0)
    jax.block_until_ready(loss_bf16)
    ref_bf16 = _focal_loss_ref(logits_bf16, targets, alpha=1.0, gamma=2.0)
    np.testing.assert_allclose(np.asarray(loss_bf16), np.asarray(ref_bf16),
                               rtol=1e-4, atol=1e-5)

    # Multi-tile + ragged + 2-way-split path (forced small tile) to exercise
    # the clamped-block / row-mask logic.
    N2, C2 = 104, 24
    logits2 = jax.random.normal(k3, (N2, C2), dtype=jnp.float32)
    targets2 = jax.random.randint(k4, (N2,), 0, C2, dtype=jnp.int32)
    loss2 = focal_loss(logits2, targets2, alpha=0.5, gamma=2.0, tile_n_override=16)
    jax.block_until_ready(loss2)
    ref2 = _focal_loss_ref(logits2, targets2, alpha=0.5, gamma=2.0)
    np.testing.assert_allclose(np.asarray(loss2), np.asarray(ref2), rtol=1e-5, atol=1e-6)

    print("KERNEL_OK")
</pallas_src>

<mosaic_0001>
module attributes {stable_mosaic.version = 11 : i64} {
  func.func @_focal_loss_kernel(%arg0: i32, %arg1: i32, %arg2: memref<8x16xf32, #tpu.memory_space<vmem>>, %arg3: memref<8x1xi32, #tpu.memory_space<vmem>>, %arg4: memref<8x128xf32, #tpu.memory_space<vmem>>) attributes {dimension_semantics = [#tpu.dimension_semantics<parallel>, #tpu.dimension_semantics<arbitrary>], iteration_bounds = array<i64: 2, 1>, scalar_prefetch = 0 : i64, scratch_operands = 0 : i64, tpu.core_type = #tpu.core_type<tc>, window_params = [{transform_indices = @transform_0, window_bounds = array<i64: 8, 16>}, {transform_indices = @transform_1, window_bounds = array<i64: 8, 1>}, {transform_indices = @transform_2, window_bounds = array<i64: 8, 128>}]} {
    %c0_i32 = arith.constant 0 : i32
    %0 = arith.cmpi eq, %arg1, %c0_i32 : i32
    %1 = arith.extui %0 : i1 to i32
    %c0_i32_0 = arith.constant 0 : i32
    %2 = arith.cmpi ne, %1, %c0_i32_0 : i32
    scf.if %2 {
      %cst_18 = arith.constant 0.000000e+00 : f32
      %50 = vector.broadcast %cst_18 : f32 to vector<8x128xf32>
      %c0_19 = arith.constant 0 : index
      %c0_20 = arith.constant 0 : index
      %51 = vector.load %arg4[%c0_19, %c0_20] : memref<8x128xf32, #tpu.memory_space<vmem>>, vector<8x128xf32>
      tpu.vector_store %arg4[%c0_19, %c0_20], %50 {strides = array<i32>} : memref<8x128xf32, #tpu.memory_space<vmem>>, vector<8x128xf32>,
    } else {
    }
    %c0 = arith.constant 0 : index
    %c0_1 = arith.constant 0 : index
    %3 = vector.load %arg2[%c0, %c0_1] : memref<8x16xf32, #tpu.memory_space<vmem>>, vector<8x16xf32>
    %c0_2 = arith.constant 0 : index
    %c0_3 = arith.constant 0 : index
    %4 = vector.load %arg3[%c0_2, %c0_3] : memref<8x1xi32, #tpu.memory_space<vmem>>, vector<8x1xi32>
    %cst = arith.constant dense<0xFF800000> : vector<8xf32>
    %5 = vector.multi_reduction <maximumf>, %3, %cst [1] : vector<8x16xf32> to vector<8xf32>
    %6 = vector.shape_cast %5 : vector<8xf32> to vector<8x1xf32>
    %7 = vector.broadcast %6 : vector<8x1xf32> to vector<8x16xf32>
    %8 = arith.subf %3, %7 : vector<8x16xf32>
    %9 = math.exp %8 : vector<8x16xf32>
    %cst_4 = arith.constant dense<0.000000e+00> : vector<8xf32>
    %10 = vector.multi_reduction <add>, %9, %cst_4 [1] : vector<8x16xf32> to vector<8xf32>
    %11 = vector.shape_cast %10 : vector<8xf32> to vector<8x1xf32>
    %12 = tpu.iota {dimensions = array<i32: 1>} : vector<8x16xi32>
    %13 = vector.broadcast %4 : vector<8x1xi32> to vector<8x16xi32>
    %14 = arith.cmpi eq, %12, %13 : vector<8x16xi32>
    %cst_5 = arith.constant 0.000000e+00 : f32
    %15 = vector.broadcast %cst_5 : f32 to vector<8x16xf32>
    %16 = arith.select %14, %8, %15 : vector<8x16xi1>, vector<8x16xf32>
    %cst_6 = arith.constant dense<0.000000e+00> : vector<8xf32>
    %17 = vector.multi_reduction <add>, %16, %cst_6 [1] : vector<8x16xf32> to vector<8xf32>
    %18 = vector.shape_cast %17 : vector<8xf32> to vector<8x1xf32>
    %19 = math.log %11 : vector<8x1xf32>
    %20 = arith.subf %19, %18 : vector<8x1xf32>
    %cst_7 = arith.constant 0.000000e+00 : f32
    %21 = vector.broadcast %cst_7 : f32 to vector<8x1xf32>
    %22 = arith.maximumf %20, %21 : vector<8x1xf32>
    %cst_8 = arith.constant 0.000000e+00 : f32
    %23 = vector.broadcast %cst_8 : f32 to vector<8x1xf32>
    %24 = arith.subf %23, %22 : vector<8x1xf32>
    %25 = math.exp %24 : vector<8x1xf32>
    %cst_9 = arith.constant 1.000000e+00 : f32
    %26 = vector.broadcast %cst_9 : f32 to vector<8x1xf32>
    %27 = arith.subf %26, %25 : vector<8x1xf32>
    %cst_10 = arith.constant 1.000000e+00 : f32
    %28 = vector.broadcast %cst_10 : f32 to vector<8x1xf32>
    %29 = arith.mulf %28, %27 : vector<8x1xf32>
    %30 = arith.mulf %29, %27 : vector<8x1xf32>
    %31 = arith.mulf %30, %22 : vector<8x1xf32>
    %c1_i32 = arith.constant 1 : i32
    %32 = arith.muli %arg0, %c1_i32 : i32
    %33 = arith.addi %32, %arg1 : i32
    %34 = tpu.iota {dimensions = array<i32: 0>} : vector<8x1xi32>
    %c8_i32 = arith.constant 8 : i32
    %35 = arith.muli %33, %c8_i32 : i32
    %36 = vector.broadcast %35 : i32 to vector<8x1xi32>
    %37 = arith.addi %34, %36 : vector<8x1xi32>
    %c8_i32_11 = arith.constant 8 : i32
    %38 = vector.broadcast %c8_i32_11 : i32 to vector<8x1xi32>
    %39 = arith.cmpi slt, %37, %38 : vector<8x1xi32>
    %cst_12 = arith.constant 0.000000e+00 : f32
    %40 = vector.broadcast %cst_12 : f32 to vector<8x1xf32>
    %41 = arith.select %39, %31, %40 : vector<8x1xi1>, vector<8x1xf32>
    %c0_13 = arith.constant 0 : index
    %c0_14 = arith.constant 0 : index
    %42 = vector.load %arg4[%c0_13, %c0_14] : memref<8x128xf32, #tpu.memory_space<vmem>>, vector<8x128xf32>
    %43 = vector.shape_cast %41 : vector<8x1xf32> to vector<1x8x1xf32>
    %cst_15 = arith.constant dense<0.000000e+00> : vector<1xf32>
    %44 = vector.multi_reduction <add>, %43, %cst_15 [1, 2] : vector<1x8x1xf32> to vector<1xf32>
    %45 = vector.shape_cast %44 : vector<1xf32> to vector<1x1x1xf32>
    %46 = vector.extract %45[0, 0, 0] : f32 from vector<1x1x1xf32>
    %47 = vector.broadcast %46 : f32 to vector<8x128xf32>
    %48 = arith.addf %42, %47 : vector<8x128xf32>
    %c0_16 = arith.constant 0 : index
    %c0_17 = arith.constant 0 : index
    %49 = vector.load %arg4[%c0_16, %c0_17] : memref<8x128xf32, #tpu.memory_space<vmem>>, vector<8x128xf32>
    tpu.vector_store %arg4[%c0_16, %c0_17], %48 {strides = array<i32>} : memref<8x128xf32, #tpu.memory_space<vmem>>, vector<8x128xf32>,
    return
  }
  func.func @transform_0(%arg0: i32, %arg1: i32) -> (i32, i32) {
    %c1_i32 = arith.constant 1 : i32
    %0 = arith.muli %arg0, %c1_i32 : i32
    %1 = arith.addi %0, %arg1 : i32
    %c0_i32 = arith.constant 0 : i32
    %2 = arith.minsi %1, %c0_i32 : i32
    %c0_i32_0 = arith.constant 0 : i32
    %c0_i32_1 = arith.constant 0 : i32
    return %2, %c0_i32_0 : i32, i32
  }
  func.func @transform_1(%arg0: i32, %arg1: i32) -> (i32, i32) {
    %c1_i32 = arith.constant 1 : i32
    %0 = arith.muli %arg0, %c1_i32 : i32
    %1 = arith.addi %0, %arg1 : i32
    %c0_i32 = arith.constant 0 : i32
    %2 = arith.minsi %1, %c0_i32 : i32
    %c0_i32_0 = arith.constant 0 : i32
    %c0_i32_1 = arith.constant 0 : i32
    return %2, %c0_i32_0 : i32, i32
  }
  func.func @transform_2(%arg0: i32, %arg1: i32) -> (i32, i32) {
    %c0_i32 = arith.constant 0 : i32
    %c0_i32_0 = arith.constant 0 : i32
    return %arg0, %c0_i32 : i32, i32
  }
}

</mosaic_0001>

<bundles_post_ra>
// kernel: tpu_custom_call.1
= control target key start
LH: loop header
LB: loop body
LE: loop exit
PB: predicated region body
PF: predicated region fallthrough
CT: control target
= control target key end

     0   :  { %7 = vsyncpa [#allocation3], 0  ;;  %s664_s0 = inlined_call_operand.vmem [shape: f32[8,16], index: 0, kind: input, shape index: {}]   ;;  %s665_s1 = inlined_call_operand.vmem [shape: s32[8,1], index: 1, kind: input, shape index: {}]   ;;  %s666_s2 = inlined_call_operand.hbm [shape: f32[16,128], index: 2, kind: output, shape index: {}]  }
   0x1   :  { %9 = vsyncpa [#allocation3 + $0x1], 0  ;;  %s545_s9 = smov 0   ;;  %s547_s10 = smov 0  }
   0x2   :  { %s549_s11 = smov 0   ;;  %s551_s12 = smov 0  }
   0x3   :  { %s553_s13 = smov 0   ;;  %s555_s14 = smov 0  }
   0x4 LB: > { %s363_s15 = sadd.s32 4294967295, %s526_s14   ;;  %s364_s16 = sadd.s32 4294967294, %s526_s14   ;;  %s526_s14 = sphi %s555_s14, %s15_s14   ;;  %s522_s13 = sphi %s553_s13, %s673_s13   ;;  %s518_s12 = sphi %s551_s12, %s672_s12   ;;  %s514_s11 = sphi %s549_s11, %s671_s11   ;;  %s510_s10 = sphi %s547_s10, %s670_s10   ;;  %s506_s9 = sphi %s545_s9, %s669_s9  }
   0x5   : > { %s27_s17 = sadd.s32 1, %s522_s13  ;;  %s98_s18 = sadd.s32 1, %s514_s11 }
   0x6   : > { %p29_p0 = scmp.ge.s32.totalorder %s27_s17, 2  ;;  %p108_p1 = scmp.ne.s32.totalorder %s514_s11, %s510_s10 }
   0x7   : > { %p109_p2 = scmp.eq.s32.totalorder %s363_s15, 1  ;;  %p114_p3 = scmp.ne.s32.totalorder %s510_s10, %s506_s9 }
   0x8   : > { %s675_s17 = smov (%p29_p0, %s27_s17), 0  ;;  %p115_p5 = scmp.eq.s32.totalorder %s364_s16, 1 }
   0x9   : > { %p585_p4 = por %p109_p2, %p108_p1  ;;  %s95_s20 = ssub.s32 %s522_s13, %s675_s17 }
   0xa   : > { %p367_p6 = scmp.ge.s32.totalorder %s526_s14, 1  ;;  %p96_p7 = scmp.eq.s32.totalorder %s95_s20, 0 }
   0xb   : > { %p592_p8 = por %p115_p5, %p114_p3  ;;  %p159_p9 = scmp.lt.s32.totalorder %s526_s14, 3 }
   0xc   : > { %s598_s22 = scalar_select %p96_p7, %s514_s11, %s98_s18  }
   0xd   : > { %p160_p10 = pnand %p367_p6, %p159_p9 }
   0xe   : > { %p191_p11 = scmp.lt.s32.totalorder (!%p160_p10), %s518_s12, 0  ;;  %v528_v0 = vmov (!%p160_p10), 0   ;;  %vm217_vm0 = vcmask (!%p160_p10), 130048   ;;  %v227_v7 = vlaneseq (!%p160_p10)  ;;  %s377_s3 = sshll.u32 (!%p160_p10), %s518_s12, 3  ;;  %vm256_vm3 = vcmask (!%p160_p10), 7168  }
   0xf   : > { %163 = sbr.rel (%p160_p10) target bundleno = 588 (0x24c), region = 28  ;;  %441 = vset.pattern.permute.xlu0 (!%p160_p10), %v528_v0  ;;  %v251_v23 = vstv (!%p160_p10), %s377_s3  ;;  %s187_s4 = sand.u32 (!%p160_p10), 1, %s510_s10  }
  0x10   : > { %v228_v8 = vand.u32 (!%p160_p10), 127, %v227_v7  ;;  %v249_v22 = vshrl.u32 (!%p160_p10), %v227_v7, 7  ;;  %s368_s5 = sshll.u32 (!%p160_p10), %s187_s4, 3  ;;  %s379_s6 = sshll.u32 (!%p160_p10), %s518_s12, 7 }
  0x11   : > { %s189_s7 = scalar_lea.vmem (!%p160_p10), [#allocation2], %s368_s5  ;;  %s617_s20 = scalar_lea.hbm (!%p160_p10), %s666_s2, %s379_s6 }
  0x12   : > { %v252_v25 = vadd.s32 (!%p160_p10), %v251_v23, %v249_v22  ;;  %s284_s8 = sshll.u32 (!%p160_p10), %s189_s7, 4  ;;  %s619_s8 = int_to_ptr.vmem [resolvable:$true] %s284_s8 }
  0x14   : > { %vm253_vm2 = vcmp.lt.s32.totalorder (!%p160_p10), %v252_v25, 8 }
  0x16   : > { %s192_s23 = scalar_select %p191_p11, %s518_s12, 0 }
  0x17   : > { %s529_s12 = smov [#allocation2]  }
  0x18   : > { %s677_s23 = smov (!%p191_p11, %s192_s23), 0  ;;  %s452_s25 = sshll.u32 %s529_s12, 4  ;;  %s453_s25 = int_to_ptr.vmem [resolvable:$false] %s452_s25 }
  0x19   : > { %s372_s24 = sshll.u32 %s677_s23, 3  ;;  %s271_s23 = scalar_lea.sflag [#allocation3], %s187_s4 }
  0x1a   : > { %s196_s27 = scalar_lea.vmem %s664_s0, %s372_s24  ;;  %s206_s30 = scalar_lea.vmem %s665_s1, %s372_s24 }
  0x1b   : > { %v215_v1 = vld [vmem:[%s196_s27] sm:$0xff]  ;;  %s448_s24 = scalar_lea.vmem %s619_s8, 128  ;;  %s454_s26 = scalar_lea.vmem %s453_s25, 256 }
  0x1c   : > { %v218_v2 = vsel %vm217_vm0, %v215_v1, -inf  ;;  %v216_v3 = vld [vmem:[%s206_s30] sm:$0xff]  ;;  %p449_p12 = scmp.ne.s32.totalorder %s619_s8, %s448_s24  ;;  %p455_p1 = scmp.lt.s32.totalorder %s619_s8, %s453_s25 }
  0x1d   : > { %219 = vmax.xlane.f32.xlu0 %v218_v2  ;;  %p456_p2 = scmp.lt.s32.totalorder %s454_s26, %s448_s24 }
  0x1e   : > { %p450_p13 = pnand %p449_p12, %p585_p4 }
  0x1f   : > { %p457_p3 = por %p456_p2, %p455_p1 }
  0x20   : > { %p451_p0 = pneg %p450_p13 }
  0x22   : > { %p458_p5 = pnand %p457_p3, %p451_p0 }
  0x33   : > { %230 = vperm.xlu0 %441, %v216_v3  }
  0xaa   : > { %v220_v4 = vpop.xlane.xlu0 %219 }
  0xab   : > { %v221_v5 = vsub.f32 %v215_v1, %v220_v4 }
  0xad   : > { %v222_v6 = vmul.f32 1.442695, %v221_v5 }
  0xaf   : > { %442 = vpow2.f32 %v222_v6 }
  0xb2   : > { %v231_v9 = vpop.permute.xlu0 %230 }
  0xb3   : > { %vm232_vm1 = vcmp.eq.s32.totalorder %v228_v8, %v231_v9 }
  0xb4   : > { %v233_v12 = vsel %vm232_vm1, %v221_v5, 0.0 }
  0xb5   : > { %v234_v13 = vsel %vm217_vm0, %v233_v12, 0.0 }
  0xb9   : > { %v443_v10 = vpop.eup %442 }
  0xba   : > { %v224_v11 = vsel %vm217_vm0, %v443_v10, 0.0 }
  0xbb   : > { %225 = vadd.xlane.f32.xlu1 %v224_v11 }
  0xbf   : > { %235 = vadd.xlane.f32.xlu1 %v234_v13 }
 0x148   : > { %v226_v14 = vpop.xlane.xlu1 %225 }
 0x149   : > { %444 = vlog2.f32 %v226_v14 }
 0x14c   : > { %v236_v17 = vpop.xlane.xlu1 %235 }
 0x153   : > { %v445_v15 = vpop.eup %444 }
 0x154   : > { %v238_v16 = vmul.f32 0.6931472, %v445_v15 }
 0x156   : > { %v239_v18 = vsub.f32 %v238_v16, %v236_v17 }
 0x158   : > { %v240_v19 = vmax.f32 %v239_v18, 0.0 }
 0x15a   : > { %v241_v20 = vsub.f32 0.0, %v240_v19 }
 0x15c   : > { %v242_v21 = vmul.f32 1.442695, %v241_v20 }
 0x15e   : > { %446 = vpow2.f32 %v242_v21 }
 0x168   : > { %v447_v24 = vpop.eup %446 }
 0x169   : > { %v244_v26 = vsub.f32 1.0, %v447_v24 }
 0x16b   : > { %v245_v27 = vmul.f32 %v244_v26, %v244_v26 }
 0x16d   : > { %v246_v28 = vmul.f32 %v245_v27, %v240_v19 }
 0x16f   : > { %v254_v29 = vsel %vm253_vm2, %v246_v28, 0.0 }
 0x170   : > { %v257_v30 = vsel %vm256_vm3, %v254_v29, 0.0 }
 0x171   : > { %258 = vadd.xlane.f32.xlu1 %v257_v30 }
 0x1fe   : > { %v259_v31 = vpop.xlane.xlu1 %258 }
 0x1ff   : > { %v260_v32 = vrot.slane %v259_v31, 4 }
 0x201   : > { %v261_v33 = vadd.f32 %v260_v32, %v259_v31 }
 0x203   : > { %v262_v34 = vrot.slane %v261_v33, 2 }
 0x205   : > { %v263_v35 = vadd.f32 %v262_v34, %v261_v33 }
 0x207   : > { %v264_v36 = vrot.slane %v263_v35, 1 }
 0x209   : > { %v265_v37 = vadd.f32 %v264_v36, %v263_v35 }
 0x20b   : > { %382 = vpush %v265_v37 }
 0x23c   : > { %s383_s15 = spop %382 }
 0x23d   : > { %v267_v38 = vstv %s383_s15 }
 0x23e   : > { %269 = vst [vmem:[%s189_s7] sm:$0xff] %v267_v38 }
 0x23f   : > { %461 = shalt.err (!%p458_p5)
}
 0x240   : > { %s462_s27 = scalar_lea.hbm %s617_s20, 128  ;;  %s466_s30 = scalar_lea.hbm %s666_s2, 256 }
 0x241   : > { %p463_p6 = scmp.ne.s32.totalorder %s617_s20, %s462_s27  ;;  %p467_p10 = scmp.lt.u32.totalorder %s617_s20, %s666_s2 }
 0x242   : > { %p468_p11 = scmp.lt.u32.totalorder %s466_s30, %s462_s27  ;;  %p470_p13 = scmp.lt.u32.totalorder %s462_s27, %s617_s20 }
 0x243   : > { %p464_p7 = pnand %p463_p6, %p585_p4 }
 0x244   : > { %p469_p12 = por %p468_p11, %p467_p10 }
 0x245   : > { %p465_p9 = pneg %p464_p7 }
 0x246   : > { %p471_p0 = por %p470_p13, %p469_p12 }
 0x248   : > { %p472_p1 = pnand %p471_p0, %p465_p9 }
 0x24a   : > { %475 = shalt.err (!%p472_p1)
}
 0x24b   : > { %384 = dma.vmem_to_hbm [thread:$0]  (%p585_p4), %s619_s8, 128, %s617_s20, %s271_s23  }
 0x24c PF: > { %p390_p2 = scmp.ge.s32.totalorder %s526_s14, 2  ;;  %s296_s5 = sand.u32 1, %s506_s9  }
 0x24d   : > { %s297_s6 = scalar_lea.sflag [#allocation3], %s296_s5 }
 0x24e   : > { %p387_p3 = pnand %p390_p2, %p592_p8 }
 0x250   : > { %501 = dma.done.wait (!%p387_p3), %s297_s6, 128  }
 0x251   : > { %503 = vsyncadd (!%p387_p3), %s297_s6, 4294967168  ;;  %s15_s14 = sadd.s32 1, %s526_s14   ;;  %s669_s9 = smov %s510_s10 }
 0x252   : > { %p12_p5 = scmp.ge.s32.totalorder %s15_s14, 4   ;;  %s670_s10 = smov %s514_s11 }
 0x253   : > { %s671_s11 = smov %s598_s22  ;;  %s672_s12 = smov %s522_s13 }
 0x254   : > { %s673_s13 = smov %s675_s17  ;;  %14 = sbr.rel (!%p12_p5) target bundleno = 4 (0x4), region = 70 }
 0x25b   :  { %302 = vsyncpa [#allocation3], 1 }
 0x25c   :  { %304 = vsyncpa [#allocation3 + $0x1], 1 }

</bundles_post_ra>
